<compile_context>
chip_gen: v6e
topology: v6e:2x2x1
jax: 0.10.0
libtpu: 0.0.40
codegen_flags: <defaults>
</compile_context>

<pallas_src>
import jax
import jax.numpy as jnp
from jax.experimental import pallas as pl
from jax.experimental.pallas import tpu as pltpu

_MiB = 1024 * 1024


def _round_up(x: int, m: int) -> int:
    return (x + m - 1) // m * m


def _vmem_capacity_bytes() -> int:
    """Per-TensorCore VMEM capacity; conservative fallback = v7x (64 MiB)."""
    try:
        return int(pltpu.get_tpu_info().vmem_capacity_bytes)
    except Exception:
        return 64 * _MiB


def prepare_adjacency(adj, *, compute_dtype=jnp.bfloat16):
    """One-time cast + lane-aligned zero-pad of the adjacency matrix.

    Call once and reuse the result across layers / training steps so the
    N^2 cast/pad pass is amortized instead of paid on every forward call.
    """
    n = adj.shape[0]
    n_pad = _round_up(n, 128)
    if adj.dtype != compute_dtype:
        adj = adj.astype(compute_dtype)
    if n_pad != n:
        adj = jnp.pad(adj, ((0, n_pad - n), (0, n_pad - n)))
    return adj


# ---------------------------------------------------------------------------
# Stage 1: per-node projection  h = X @ W_t   (W_t already [F_in_pad, F_out_pad])
# ---------------------------------------------------------------------------
def _project_kernel(x_ref, w_ref, h_ref):
    # x_ref: [TM, F_in_pad], w_ref: [F_in_pad, F_out_pad], h_ref: [TM, F_out_pad]
    h_ref[...] = jnp.dot(
        x_ref[...], w_ref[...], preferred_element_type=jnp.float32
    ).astype(h_ref.dtype)


# ---------------------------------------------------------------------------
# Stage 2a: aggregation with VMEM-resident h (DMA'd once, sliced per k step).
#   out = adj @ h + b, accumulated directly into the f32 output block
#   (its block index is constant over k, so it stays resident in VMEM).
# ---------------------------------------------------------------------------
def _aggregate_resident_kernel(adj_ref, h_ref, b_ref, out_ref):
    # adj_ref: [TM, TK], h_ref: [N_pad, F_out_pad] (resident), b_ref: [1, F_out_pad]
    # out_ref: [TM, F_out_pad] f32
    k = pl.program_id(1)

    @pl.when(k == 0)
    def _():
        out_ref[...] = jnp.zeros_like(out_ref)

    tk = adj_ref.shape[1]
    start = pl.multiple_of(k * tk, 128)
    out_ref[...] += jnp.dot(
        adj_ref[...], h_ref[pl.ds(start, tk), :],
        preferred_element_type=jnp.float32,
    )

    @pl.when(k == pl.num_programs(1) - 1)
    def _():
        out_ref[...] += b_ref[...]


# ---------------------------------------------------------------------------
# Stage 2b: fallback when h does not fit resident -- stream (TK, F_out) blocks.
# ---------------------------------------------------------------------------
def _aggregate_streamed_kernel(adj_ref, h_ref, b_ref, out_ref):
    # adj_ref: [TM, TK], h_ref: [TK, F_out_pad], b_ref: [1, F_out_pad]
    k = pl.program_id(1)

    @pl.when(k == 0)
    def _():
        out_ref[...] = jnp.zeros_like(out_ref)

    out_ref[...] += jnp.dot(
        adj_ref[...], h_ref[...], preferred_element_type=jnp.float32
    )

    @pl.when(k == pl.num_programs(1) - 1)
    def _():
        out_ref[...] += b_ref[...]


# ---------------------------------------------------------------------------
# Wrapper
# ---------------------------------------------------------------------------
def graph_convolution(adj, features, weight, bias, *,
                      compute_dtype=jnp.bfloat16,
                      max_tm=512, max_tk=1024,
                      force_stream_h=False):
    """GCN layer forward: Linear(adj @ features).

    adj:      [N, N] (or already prepared via prepare_adjacency -> [n_pad, n_pad])
    features: [N, F_in]
    weight:   [F_out, F_in]   (PyTorch nn.Linear layout)
    bias:     [F_out]
    Returns float32 [N, F_out].
    """
    N = features.shape[0]
    F_in = features.shape[1]
    F_out = weight.shape[0]

    n_pad = _round_up(N, 128)
    f_in_pad = _round_up(F_in, 128)
    f_out_pad = _round_up(F_out, 128)
    dsize = jnp.dtype(compute_dtype).itemsize

    # ---- per-generation VMEM budget (v7x: 64 MiB/TC, v5e/v6e: 128 MiB) ----
    cap = _vmem_capacity_bytes()
    vmem_limit = max(32 * _MiB, min(cap - 8 * _MiB, 100 * _MiB))
    budget = vmem_limit - 6 * _MiB   # headroom for compiler-internal scratch

    # ---- tile plan: tiles must divide n_pad (no lcm padding blowup) --------
    max_tm = max(int(max_tm), 128)
    max_tk = max(int(max_tk), 128)
    tm_cands = [d for d in (512, 384, 256, 128)
                if d <= max_tm and n_pad % d == 0] or [128]
    tk_cands = [d for d in (1024, 768, 512, 384, 256, 128)
                if d <= max_tk and n_pad % d == 0] or [128]

    # Prefer the largest row tile that still leaves >=2 blocks on the parallel
    # axis (v7x megacore needs >=2 to use both TensorCores).
    tm = next((d for d in tm_cands if n_pad // d >= 2), tm_cands[-1])

    def _stage2_bytes(tk_, resident):
        adj_b = 2 * tm * tk_ * dsize                  # double-buffered adj tile
        out_b = 2 * tm * f_out_pad * 4                # f32 output block
        bias_b = 2 * f_out_pad * 4
        h_b = (2 * n_pad * f_out_pad * dsize) if resident \
            else (2 * tk_ * f_out_pad * dsize)
        return adj_b + out_b + bias_b + h_b

    tk = next((d for d in tk_cands if _stage2_bytes(d, False) <= budget),
              tk_cands[-1])
    resident_h = (not force_stream_h) and _stage2_bytes(tk, True) <= budget

    # ---- layout plumbing (adj pad/cast skipped when already prepared) ------
    if adj.shape[0] == n_pad and adj.dtype == compute_dtype:
        adj_p = adj                          # already prepared (amortized path)
    elif adj.shape[0] in (N, n_pad):
        adj_p = prepare_adjacency(adj, compute_dtype=compute_dtype)
    else:
        raise ValueError(
            f"adjacency shape {adj.shape} inconsistent with N={N} (pad {n_pad})")

    feat_p = jnp.pad(features.astype(compute_dtype),
                     ((0, n_pad - N), (0, f_in_pad - F_in)))
    w_t_p = jnp.pad(weight.T.astype(compute_dtype),          # [F_in, F_out]
                    ((0, f_in_pad - F_in), (0, f_out_pad - F_out)))
    b_p = jnp.pad(bias.astype(jnp.float32),
                  (0, f_out_pad - F_out)).reshape(1, f_out_pad)

    cparams1 = pltpu.CompilerParams(
        dimension_semantics=("parallel",), vmem_limit_bytes=vmem_limit)
    cparams2 = pltpu.CompilerParams(
        dimension_semantics=("parallel", "arbitrary"),
        vmem_limit_bytes=vmem_limit)

    # ---- stage 1: h = features @ W^T  (row-tiled, weight loaded once) ------
    h = pl.pallas_call(
        _project_kernel,
        out_shape=jax.ShapeDtypeStruct((n_pad, f_out_pad), compute_dtype),
        grid=(n_pad // tm,),
        in_specs=[
            pl.BlockSpec((tm, f_in_pad), lambda i: (i, 0)),
            pl.BlockSpec((f_in_pad, f_out_pad), lambda i: (0, 0)),
        ],
        out_specs=pl.BlockSpec((tm, f_out_pad), lambda i: (i, 0)),
        compiler_params=cparams1,
    )(feat_p, w_t_p)

    # ---- stage 2: out = adj @ h + b  (accumulate into resident f32 output) --
    if resident_h:
        agg_kernel = _aggregate_resident_kernel
        h_spec = pl.BlockSpec((n_pad, f_out_pad), lambda i, k: (0, 0))
    else:
        agg_kernel = _aggregate_streamed_kernel
        h_spec = pl.BlockSpec((tk, f_out_pad), lambda i, k: (k, 0))

    out_p = pl.pallas_call(
        agg_kernel,
        out_shape=jax.ShapeDtypeStruct((n_pad, f_out_pad), jnp.float32),
        grid=(n_pad // tm, n_pad // tk),
        in_specs=[
            pl.BlockSpec((tm, tk), lambda i, k: (i, k)),
            h_spec,
            pl.BlockSpec((1, f_out_pad), lambda i, k: (0, 0)),
        ],
        out_specs=pl.BlockSpec((tm, f_out_pad), lambda i, k: (i, 0)),
        compiler_params=cparams2,
    )(adj_p, h, b_p)

    # Padded rows get bias added before slicing -- harmless, sliced off here.
    return out_p[:N, :F_out]


# ---------------------------------------------------------------------------
# Self-test
# ---------------------------------------------------------------------------
def _make_inputs(key, n, f_in, f_out):
    k_adj, k_feat, k_w, k_b = jax.random.split(key, 4)
    a = jax.random.uniform(k_adj, (n, n), dtype=jnp.float32)
    adj = (a + a.T) * 0.5 + jnp.eye(n, dtype=jnp.float32)
    adj = adj / jnp.sum(adj, axis=1, keepdims=True)      # row-normalized
    features = jax.random.normal(k_feat, (n, f_in), dtype=jnp.float32)
    bound = 1.0 / jnp.sqrt(jnp.float32(f_in))
    weight = jax.random.uniform(k_w, (f_out, f_in), dtype=jnp.float32,
                                minval=-bound, maxval=bound)
    bias = jax.random.uniform(k_b, (f_out,), dtype=jnp.float32,
                              minval=-bound, maxval=bound)
    return adj, features, weight, bias


if __name__ == "__main__":
    key = jax.random.PRNGKey(0)
    k0, k1 = jax.random.split(key)

    # ---- test 1: small graph, f32 (tight) and default bf16 (loose) paths ----
    N, F_IN, F_OUT = 64, 32, 16
    adj, features, weight, bias = _make_inputs(k0, N, F_IN, F_OUT)
    ref = (adj @ features) @ weight.T + bias              # original PyTorch order

    out_f32 = jax.block_until_ready(
        graph_convolution(adj, features, weight, bias,
                          compute_dtype=jnp.float32))
    assert out_f32.shape == (N, F_OUT)
    assert jnp.allclose(out_f32, ref, atol=1e-4, rtol=1e-4), \
        float(jnp.max(jnp.abs(out_f32 - ref)))

    # Default bf16 path; adjacency prepared once (amortized cast/pad).
    adj_bf16 = prepare_adjacency(adj)                     # bf16, lane-padded
    out_bf16 = jax.block_until_ready(
        graph_convolution(adj_bf16, features, weight, bias))
    assert out_bf16.shape == (N, F_OUT)
    assert jnp.allclose(out_bf16, ref, atol=5e-2, rtol=5e-2), \
        float(jnp.max(jnp.abs(out_bf16 - ref)))

    # ---- test 2: unaligned N, multi-tile reduction; resident and streamed h --
    N2, F_IN2, F_OUT2 = 300, 40, 24
    adj2, features2, weight2, bias2 = _make_inputs(k1, N2, F_IN2, F_OUT2)
    ref2 = (adj2 @ features2) @ weight2.T + bias2

    out_res = jax.block_until_ready(
        graph_convolution(adj2, features2, weight2, bias2,
                          compute_dtype=jnp.float32,
                          max_tm=128, max_tk=128))          # resident h, 3 k-steps
    assert jnp.allclose(out_res, ref2, atol=1e-4, rtol=1e-4), \
        float(jnp.max(jnp.abs(out_res - ref2)))

    out_str = jax.block_until_ready(
        graph_convolution(adj2, features2, weight2, bias2,
                          compute_dtype=jnp.float32,
                          max_tm=128, max_tk=128,
                          force_stream_h=True))              # streamed-h fallback
    assert jnp.allclose(out_str, ref2, atol=1e-4, rtol=1e-4), \
        float(jnp.max(jnp.abs(out_str - ref2)))

    print("KERNEL_OK")
</pallas_src>

<mosaic_0001>
module attributes {stable_mosaic.version = 11 : i64} {
  func.func @_project_kernel(%arg0: i32, %arg1: memref<128x128xf32, #tpu.memory_space<vmem>>, %arg2: memref<128x128xf32, #tpu.memory_space<vmem>>, %arg3: memref<128x128xf32, #tpu.memory_space<vmem>>) attributes {dimension_semantics = [#tpu.dimension_semantics<parallel>], iteration_bounds = array<i64: 1>, scalar_prefetch = 0 : i64, scratch_operands = 0 : i64, tpu.core_type = #tpu.core_type<tc>, window_params = [{transform_indices = @transform_0, window_bounds = array<i64: 128, 128>}, {pipeline_mode = #tpu.pipeline_mode<synchronous>, transform_indices = @transform_1, window_bounds = array<i64: 128, 128>}, {transform_indices = @transform_2, window_bounds = array<i64: 128, 128>}]} {
    %c0 = arith.constant 0 : index
    %c0_0 = arith.constant 0 : index
    %0 = vector.load %arg1[%c0, %c0_0] : memref<128x128xf32, #tpu.memory_space<vmem>>, vector<128x128xf32>
    %c0_1 = arith.constant 0 : index
    %c0_2 = arith.constant 0 : index
    %1 = vector.load %arg2[%c0_1, %c0_2] : memref<128x128xf32, #tpu.memory_space<vmem>>, vector<128x128xf32>
    %cst = arith.constant dense<0.000000e+00> : vector<128x128xf32>
    %2 = tpu.matmul %0, %1, %cst {dimension_numbers = #tpu.dot_dimension_numbers<[1], [0], [0], [1], [0, 0, 1, 1], [], []>} : vector<128x128xf32>, vector<128x128xf32>, vector<128x128xf32> -> vector<128x128xf32>
    %c0_3 = arith.constant 0 : index
    %c0_4 = arith.constant 0 : index
    %3 = vector.load %arg3[%c0_3, %c0_4] : memref<128x128xf32, #tpu.memory_space<vmem>>, vector<128x128xf32>
    tpu.vector_store %arg3[%c0_3, %c0_4], %2 {strides = array<i32>} : memref<128x128xf32, #tpu.memory_space<vmem>>, vector<128x128xf32>,
    return
  }
  func.func @transform_0(%arg0: i32) -> (i32, i32) {
    %c0_i32 = arith.constant 0 : i32
    %c0_i32_0 = arith.constant 0 : i32
    return %arg0, %c0_i32 : i32, i32
  }
  func.func @transform_1(%arg0: i32) -> (i32, i32) {
    %c0_i32 = arith.constant 0 : i32
    %c0_i32_0 = arith.constant 0 : i32
    %c0_i32_1 = arith.constant 0 : i32
    return %c0_i32, %c0_i32_0 : i32, i32
  }
  func.func @transform_2(%arg0: i32) -> (i32, i32) {
    %c0_i32 = arith.constant 0 : i32
    %c0_i32_0 = arith.constant 0 : i32
    return %arg0, %c0_i32 : i32, i32
  }
}

</mosaic_0001>

<bundles_post_ra>
// kernel: tpu_custom_call.1
= control target key start
LH: loop header
LB: loop body
LE: loop exit
PB: predicated region body
PF: predicated region fallthrough
CT: control target
= control target key end

     0   :  { %7 = vsyncpa [#allocation3], 0  ;;  %s480_s0 = inlined_call_operand.hbm [shape: f32[128,128], index: 0, kind: input, shape index: {}]   ;;  %s481_s1 = inlined_call_operand.hbm [shape: f32[128,128], index: 1, kind: input, shape index: {}]   ;;  %s482_s2 = inlined_call_operand.hbm [shape: f32[128,128], index: 2, kind: output, shape index: {}]  }
   0x1   :  { %8 = vsyncpa [#allocation6], 0 }
   0x2   :  { %9 = vsyncpa [#allocation4], 0  ;;  %s442_s9 = smov [#allocation2]  }
   0x3   :  { %s15_s10 = sshll.u32 %s442_s9, 4  ;;  %s16_s10 = int_to_ptr.vmem [resolvable:$true] %s15_s10 }
   0x4   :  { %s384_s11 = scalar_lea.vmem %s16_s10, 2048  ;;  %p389_p1 = scmp.lt.s32.totalorder %s16_s10, %s16_s10 }
   0x5   :  { %p385_p0 = scmp.ne.s32.totalorder %s16_s10, %s384_s11  ;;  %p390_p2 = scmp.lt.s32.totalorder %s384_s11, %s384_s11 }
   0x7   :  { %p391_p3 = por %p390_p2, %p389_p1 }
   0x9   :  { %p392_p4 = pnand %p391_p3, %p385_p0 }
   0xb   :  { %395 = shalt.err (!%p392_p4)
}
   0xc   :  { %s443_s12 = smov 128   ;;  %s444_s13 = smov 8  }
   0xd   :  { %21 = dma.hbm_to_vmem [thread:$0]  %s480_s0, 2048, %s16_s10, [#allocation3], %s443_s12, %s443_s12, %s444_s13  }
   0xe   :  { %s445_s16 = smov [#allocation5]  }
   0xf   :  { %s27_s17 = sshll.u32 %s445_s16, 4  ;;  %s28_s17 = int_to_ptr.vmem [resolvable:$true] %s27_s17 }
  0x10   :  { %s404_s18 = scalar_lea.vmem %s28_s17, 2048  ;;  %p409_p6 = scmp.lt.s32.totalorder %s28_s17, %s28_s17 }
  0x11   :  { %p405_p5 = scmp.ne.s32.totalorder %s28_s17, %s404_s18  ;;  %p410_p7 = scmp.lt.s32.totalorder %s404_s18, %s404_s18 }
  0x13   :  { %p411_p8 = por %p410_p7, %p409_p6 }
  0x15   :  { %p412_p9 = pnand %p411_p8, %p405_p5 }
  0x17   :  { %415 = shalt.err (!%p412_p9)
}
  0x18   :  { %33 = dma.hbm_to_vmem [thread:$0]  %s481_s1, 2048, %s28_s17, [#allocation6], %s443_s12, %s443_s12, %s444_s13  }
  0x19   :  { %436 = dma.done.wait [#allocation3], 2048  }
  0x1a   :  { %437 = vsyncadd [#allocation3], 4294965248 }
  0x1b   :  { %438 = dma.done.wait [#allocation6], 2048  }
  0x1c   :  { %439 = vsyncadd [#allocation6], 4294965248  ;;  %v71_v0 = vld [vmem:[#allocation5 + $0x78] sm:$0xff]  ;;  %v70_v1 = vld [vmem:[#allocation5 + $0x70] sm:$0xff]  ;;  %s446_s0 = smov [#allocation7]  }
  0x1d   :  { %283 = vmatprep.subr.mxu0 %v71_v0  ;;  %339 = vmatprep.subr.mxu1 %v71_v0  ;;  %v69_v2 = vld [vmem:[#allocation5 + $0x68] sm:$0xff]  ;;  %v68_v3 = vld [vmem:[#allocation5 + $0x60] sm:$0xff]  ;;  %v67_v4 = vld [vmem:[#allocation5 + $0x58] sm:$0xff]  ;;  %s238_s1 = sshll.u32 %s446_s0, 4  ;;  %s239_s1 = int_to_ptr.vmem [resolvable:$true] %s238_s1 }
  0x1e   :  { %284 = vmatpush3.msra.mxu0 %v71_v0  ;;  %355 = vmatpush3.msra.mxu1 %v71_v0  ;;  %v66_v5 = vld [vmem:[#allocation5 + $0x50] sm:$0xff]  ;;  %v65_v6 = vld [vmem:[#allocation5 + $0x48] sm:$0xff]  ;;  %v64_v7 = vld [vmem:[#allocation5 + $0x40] sm:$0xff]  ;;  %s416_s21 = scalar_lea.vmem %s239_s1, 2048  ;;  %p421_p11 = scmp.lt.s32.totalorder %s239_s1, %s239_s1 }
  0x1f   :  { %285 = vmatprep.subr.mxu0 %v70_v1  ;;  %340 = vmatprep.subr.mxu1 %v70_v1  ;;  %v63_v8 = vld [vmem:[#allocation5 + $0x38] sm:$0xff]  ;;  %v62_v9 = vld [vmem:[#allocation5 + $0x30] sm:$0xff]  ;;  %v61_v10 = vld [vmem:[#allocation5 + $0x28] sm:$0xff]  ;;  %p417_p10 = scmp.ne.s32.totalorder %s239_s1, %s416_s21  ;;  %p422_p12 = scmp.lt.s32.totalorder %s416_s21, %s416_s21 }
  0x20   :  { %286 = vmatpush3.msra.mxu0 %v70_v1  ;;  %356 = vmatpush3.msra.mxu1 %v70_v1  ;;  %v60_v11 = vld [vmem:[#allocation5 + $0x20] sm:$0xff]  ;;  %v59_v12 = vld [vmem:[#allocation5 + $0x18] sm:$0xff]  ;;  %v58_v13 = vld [vmem:[#allocation5 + $0x10] sm:$0xff] }
  0x21   :  { %287 = vmatprep.subr.mxu0 %v69_v2  ;;  %341 = vmatprep.subr.mxu1 %v69_v2  ;;  %v57_v14 = vld [vmem:[#allocation5 + $0x8] sm:$0xff]  ;;  %v56_v15 = vld [vmem:[#allocation5] sm:$0xff]  ;;  %v42_v20 = vld [vmem:[#allocation2 + $0x10] sm:$0xff]  ;;  %p423_p13 = por %p422_p12, %p421_p11 }
  0x22   :  { %288 = vmatpush3.msra.mxu0 %v69_v2  ;;  %357 = vmatpush3.msra.mxu1 %v69_v2  ;;  %v40_v16 = vld [vmem:[#allocation2] sm:$0xff]  ;;  %v41_v18 = vld [vmem:[#allocation2 + $0x8] sm:$0xff]  ;;  %v50_v21 = vld [vmem:[#allocation2 + $0x50] sm:$0xff] }
  0x23   :  { %289 = vmatprep.subr.mxu0 %v68_v3  ;;  %342 = vmatprep.subr.mxu1 %v68_v3  ;;  %v48_v17 = vld [vmem:[#allocation2 + $0x40] sm:$0xff]  ;;  %v49_v19 = vld [vmem:[#allocation2 + $0x48] sm:$0xff]  ;;  %v43_v22 = vld [vmem:[#allocation2 + $0x18] sm:$0xff]  ;;  %p424_p0 = pnand %p423_p13, %p417_p10 }
  0x24   :  { %290 = vmatpush3.msra.mxu0 %v68_v3  ;;  %358 = vmatpush3.msra.mxu1 %v68_v3  ;;  %v51_v23 = vld [vmem:[#allocation2 + $0x58] sm:$0xff]  ;;  %v44_v24 = vld [vmem:[#allocation2 + $0x20] sm:$0xff]  ;;  %v45_v26 = vld [vmem:[#allocation2 + $0x28] sm:$0xff] }
  0x25   :  { %291 = vmatprep.subr.mxu0 %v67_v4  ;;  %343 = vmatprep.subr.mxu1 %v67_v4  ;;  %v52_v25 = vld [vmem:[#allocation2 + $0x60] sm:$0xff]  ;;  %v53_v27 = vld [vmem:[#allocation2 + $0x68] sm:$0xff]  ;;  %v46_v28 = vld [vmem:[#allocation2 + $0x30] sm:$0xff] }
  0x26   :  { %292 = vmatpush3.msra.mxu0 %v67_v4  ;;  %359 = vmatpush3.msra.mxu1 %v67_v4  ;;  %v54_v29 = vld [vmem:[#allocation2 + $0x70] sm:$0xff]  ;;  %v47_v30 = vld [vmem:[#allocation2 + $0x38] sm:$0xff] }
  0x27   :  { %293 = vmatprep.subr.mxu0 %v66_v5  ;;  %344 = vmatprep.subr.mxu1 %v66_v5  ;;  %v55_v31 = vld [vmem:[#allocation2 + $0x78] sm:$0xff] }
  0x28   :  { %294 = vmatpush3.msra.mxu0 %v66_v5  ;;  %360 = vmatpush3.msra.mxu1 %v66_v5 }
  0x29   :  { %295 = vmatprep.subr.mxu0 %v65_v6  ;;  %345 = vmatprep.subr.mxu1 %v65_v6 }
  0x2a   :  { %296 = vmatpush3.msra.mxu0 %v65_v6  ;;  %361 = vmatpush3.msra.mxu1 %v65_v6 }
  0x2b   :  { %297 = vmatprep.subr.mxu0 %v64_v7  ;;  %346 = vmatprep.subr.mxu1 %v64_v7 }
  0x2c   :  { %298 = vmatpush3.msra.mxu0 %v64_v7  ;;  %362 = vmatpush3.msra.mxu1 %v64_v7 }
  0x2d   :  { %299 = vmatprep.subr.mxu0 %v63_v8  ;;  %347 = vmatprep.subr.mxu1 %v63_v8 }
  0x2e   :  { %300 = vmatpush3.msra.mxu0 %v63_v8  ;;  %363 = vmatpush3.msra.mxu1 %v63_v8 }
  0x2f   :  { %301 = vmatprep.subr.mxu0 %v62_v9  ;;  %348 = vmatprep.subr.mxu1 %v62_v9 }
  0x30   :  { %302 = vmatpush3.msra.mxu0 %v62_v9  ;;  %364 = vmatpush3.msra.mxu1 %v62_v9 }
  0x31   :  { %303 = vmatprep.subr.mxu0 %v61_v10  ;;  %349 = vmatprep.subr.mxu1 %v61_v10 }
  0x32   :  { %304 = vmatpush3.msra.mxu0 %v61_v10  ;;  %365 = vmatpush3.msra.mxu1 %v61_v10 }
  0x33   :  { %305 = vmatprep.subr.mxu0 %v60_v11  ;;  %350 = vmatprep.subr.mxu1 %v60_v11 }
  0x34   :  { %306 = vmatpush3.msra.mxu0 %v60_v11  ;;  %366 = vmatpush3.msra.mxu1 %v60_v11 }
  0x35   :  { %307 = vmatprep.subr.mxu0 %v59_v12  ;;  %351 = vmatprep.subr.mxu1 %v59_v12 }
  0x36   :  { %308 = vmatpush3.msra.mxu0 %v59_v12  ;;  %367 = vmatpush3.msra.mxu1 %v59_v12 }
  0x37   :  { %309 = vmatprep.subr.mxu0 %v58_v13  ;;  %352 = vmatprep.subr.mxu1 %v58_v13 }
  0x38   :  { %310 = vmatpush3.msra.mxu0 %v58_v13  ;;  %368 = vmatpush3.msra.mxu1 %v58_v13 }
  0x39   :  { %311 = vmatprep.subr.mxu0 %v57_v14  ;;  %353 = vmatprep.subr.mxu1 %v57_v14 }
  0x3a   :  { %312 = vmatpush3.msra.mxu0 %v57_v14  ;;  %369 = vmatpush3.msra.mxu1 %v57_v14 }
  0x3b   :  { %313 = vmatprep.subr.mxu0 %v56_v15  ;;  %354 = vmatprep.subr.mxu1 %v56_v15 }
  0x3c   :  { %314 = vmatpush3.msra.mxu0 %v56_v15  ;;  %370 = vmatpush3.msra.mxu1 %v56_v15 }
  0x3d   :  { %315 = vmatprep.mubr.f32.mxu0 %v40_v16  ;;  %327 = vmatprep.mubr.f32.mxu1 %v48_v17 }
  0x3e   :  { %316 = vmatmul.mubr.f32.vlgmr.msra.gmra.mxu0 %v41_v18  ;;  %328 = vmatmul.mubr.f32.vlgmr.msra.gmra.mxu1 %v49_v19 }
  0x3f   :  { %318 = vmatprep.mubr.f32.mxu0 %v42_v20  ;;  %330 = vmatprep.mubr.f32.mxu1 %v50_v21 }
  0x42   :  { %319 = vmatmul.mubr.f32.gmra.mxu0 %v43_v22  ;;  %331 = vmatmul.mubr.f32.gmra.mxu1 %v51_v23 }
  0x43   :  { %321 = vmatprep.mubr.f32.mxu0 %v44_v24  ;;  %333 = vmatprep.mubr.f32.mxu1 %v52_v25 }
  0x46   :  { %322 = vmatmul.mubr.f32.gmra.mxu0 %v45_v26  ;;  %334 = vmatmul.mubr.f32.gmra.mxu1 %v53_v27 }
  0x47   :  { %324 = vmatprep.mubr.f32.mxu0 %v46_v28  ;;  %336 = vmatprep.mubr.f32.mxu1 %v54_v29 }
  0x4a   :  { %325 = vmatmul.mubr.f32.gmra.mxu0 %v47_v30  ;;  %337 = vmatmul.mubr.f32.gmra.mxu1 %v55_v31 }
  0xfe   :  { %v317_v32 = vpop.f32.mrf.mxu0  ;;  %v329_v33 = vpop.f32.mrf.mxu1 }
  0xff   :  { %218 = vst [vmem:[#allocation7 + $0x8] sm:$0xff] %v317_v32  ;;  %226 = vst [vmem:[#allocation7 + $0x48] sm:$0xff] %v329_v33 }
 0x100   :  { %v138_v34 = vpop.f32.mrf.mxu0  ;;  %v178_v35 = vpop.f32.mrf.mxu1 }
 0x101   :  { %217 = vst [vmem:[#allocation7] sm:$0xff] %v138_v34  ;;  %225 = vst [vmem:[#allocation7 + $0x40] sm:$0xff] %v178_v35 }
 0x102   :  { %v320_v36 = vpop.f32.mrf.mxu0  ;;  %v332_v37 = vpop.f32.mrf.mxu1 }
 0x103   :  { %220 = vst [vmem:[#allocation7 + $0x18] sm:$0xff] %v320_v36  ;;  %228 = vst [vmem:[#allocation7 + $0x58] sm:$0xff] %v332_v37 }
 0x104   :  { %v148_v38 = vpop.f32.mrf.mxu0  ;;  %v188_v39 = vpop.f32.mrf.mxu1 }
 0x105   :  { %219 = vst [vmem:[#allocation7 + $0x10] sm:$0xff] %v148_v38  ;;  %227 = vst [vmem:[#allocation7 + $0x50] sm:$0xff] %v188_v39 }
 0x106   :  { %v323_v40 = vpop.f32.mrf.mxu0  ;;  %v335_v41 = vpop.f32.mrf.mxu1 }
 0x107   :  { %222 = vst [vmem:[#allocation7 + $0x28] sm:$0xff] %v323_v40  ;;  %230 = vst [vmem:[#allocation7 + $0x68] sm:$0xff] %v335_v41 }
 0x108   :  { %v158_v42 = vpop.f32.mrf.mxu0  ;;  %v198_v43 = vpop.f32.mrf.mxu1 }
 0x109   :  { %221 = vst [vmem:[#allocation7 + $0x20] sm:$0xff] %v158_v42  ;;  %229 = vst [vmem:[#allocation7 + $0x60] sm:$0xff] %v198_v43 }
 0x10a   :  { %v326_v44 = vpop.f32.mrf.mxu0  ;;  %v338_v45 = vpop.f32.mrf.mxu1 }
 0x10b   :  { %224 = vst [vmem:[#allocation7 + $0x38] sm:$0xff] %v326_v44  ;;  %232 = vst [vmem:[#allocation7 + $0x78] sm:$0xff] %v338_v45 }
 0x10c   :  { %v168_v46 = vpop.f32.mrf.mxu0  ;;  %v208_v47 = vpop.f32.mrf.mxu1 }
 0x10d   :  { %223 = vst [vmem:[#allocation7 + $0x30] sm:$0xff] %v168_v46  ;;  %231 = vst [vmem:[#allocation7 + $0x70] sm:$0xff] %v208_v47 }
 0x10e   :  { %427 = shalt.err (!%p424_p0)
}
 0x10f   :  { %244 = dma.vmem_to_hbm [thread:$0]  %s239_s1, 2048, %s482_s2, [#allocation4], %s443_s12, %s443_s12, %s444_s13  }
 0x110   :  { %440 = dma.done.wait [#allocation4], 2048  }
 0x111   :  { %441 = vsyncadd [#allocation4], 4294965248 }
 0x112   :  { %248 = vsyncpa [#allocation3], 1 }
 0x113   :  { %249 = vsyncpa [#allocation6], 1 }
 0x114   :  { %250 = vsyncpa [#allocation4], 1 }

</bundles_post_ra>
